<compile_context>
chip_gen: v7x
topology: tpu7x:2x2x1
jax: 0.10.0
libtpu: 0.0.40
codegen_flags: <defaults>
</compile_context>

<pallas_src>
import jax
import jax.numpy as jnp
import numpy as np
from jax.experimental import pallas as pl
from jax.experimental.pallas import tpu as pltpu


def _round_up(n, m):
    return ((n + m - 1) // m) * m


def _cdiv(a, b):
    return -(-a // b)


def _choose_tile_b(batch, max_tile=1024, min_grid=2, align=16):
    """Pick the batch tile: as large as possible (<= max_tile), but split into
    at least `min_grid` grid steps when the batch allows (feeds both v7x
    TensorCores), aligned to 16 rows (bf16 sublane packing) and sized tightly
    to minimise padded rows."""
    batch_a = _round_up(max(batch, 1), align)
    n_tiles = max(min_grid, _cdiv(batch_a, max_tile))
    tile_b = _round_up(_cdiv(batch_a, n_tiles), align)
    return min(tile_b, batch_a)


def critic_kernel(xa_ref, w1_ref, b1_ref, w2_ref, b2_ref, w3_ref, b3_ref,
                  o_ref):
    # fc1 on the pre-concatenated [x, a] (bf16 MXU inputs, f32 accumulate).
    h1 = jnp.dot(xa_ref[...], w1_ref[...], preferred_element_type=jnp.float32)
    h1 = jnp.maximum(h1 + b1_ref[...], 0.0)                 # ReLU in f32 (VPU)

    # fc2 + ReLU.
    h2 = jnp.dot(h1.astype(jnp.bfloat16), w2_ref[...],
                 preferred_element_type=jnp.float32)
    h2 = jnp.maximum(h2 + b2_ref[...], 0.0)

    # fc3 (single output unit): VPU broadcast-multiply + XLU cross-lane reduce
    # in f32 instead of a padded (hidden, 128) MXU pass.
    q = jnp.sum(h2 * w3_ref[...], axis=-1, keepdims=True)   # (tile_b, 1)
    o_ref[...] = q + b3_ref[...]


def critic_forward(x, a, params, max_tile_b=1024):
    """Fused Q(s, a).  params = (w1, b1, w2, b2, w3, b3); weights (in, out)."""
    w1, b1, w2, b2, w3, b3 = params
    batch, obs_dim = x.shape
    act_dim = a.shape[1]
    hidden = w1.shape[1]
    in_dim = obs_dim + act_dim

    # Merge the two fc1 matmuls: concatenate [x, a] once in the wrapper and
    # pre-cast activations + weights to bf16 (halves DMA bytes).
    xa = jnp.concatenate([x, a], axis=1).astype(jnp.bfloat16)
    w1b = w1.astype(jnp.bfloat16)
    w2b = w2.astype(jnp.bfloat16)
    w3r = w3.reshape(1, hidden).astype(jnp.float32)   # row form for VPU fc3
    b3s = b3.reshape(1, 1).astype(jnp.float32)

    # Batch tiling: large tiles, >=2 grid steps when possible, tight padding.
    tile_b = _choose_tile_b(batch, max_tile=max_tile_b)
    batch_p = _round_up(batch, tile_b)
    if batch_p != batch:
        xa = jnp.pad(xa, ((0, batch_p - batch), (0, 0)))

    resident = lambda arr: pl.BlockSpec(arr.shape, lambda i: (0, 0))

    out = pl.pallas_call(
        critic_kernel,
        out_shape=jax.ShapeDtypeStruct((batch_p, 1), jnp.float32),
        grid=(batch_p // tile_b,),
        in_specs=[
            pl.BlockSpec((tile_b, in_dim), lambda i: (i, 0)),  # [x|a] (tiled)
            resident(w1b), resident(b1),                       # fc1 (resident)
            resident(w2b), resident(b2),                       # fc2 (resident)
            resident(w3r), resident(b3s),                      # fc3 (resident)
        ],
        out_specs=pl.BlockSpec((tile_b, 1), lambda i: (i, 0)),
        compiler_params=pltpu.CompilerParams(
            dimension_semantics=("parallel",),
            vmem_limit_bytes=32 << 20,
        ),
    )(xa, w1b, b1, w2b, b2, w3r, b3s)

    return out[:batch]


def init_params(key, obs_dim, act_dim, hidden):
    """PyTorch nn.Linear-style init (uniform ±1/sqrt(fan_in)), (in, out) layout."""
    ks = jax.random.split(key, 6)

    def linear(kw, kb, fan_in, fan_out):
        bound = 1.0 / np.sqrt(fan_in)
        w = jax.random.uniform(kw, (fan_in, fan_out), jnp.float32, -bound, bound)
        b = jax.random.uniform(kb, (1, fan_out), jnp.float32, -bound, bound)
        return w, b

    w1, b1 = linear(ks[0], ks[1], obs_dim + act_dim, hidden)
    w2, b2 = linear(ks[2], ks[3], hidden, hidden)
    w3, b3 = linear(ks[4], ks[5], hidden, 1)
    return (w1, b1, w2, b2, w3, b3)


def reference_forward_f32(x, a, params):
    """Full-f32 PyTorch-equivalent reference."""
    w1, b1, w2, b2, w3, b3 = params
    xa = jnp.concatenate([x, a], axis=1)
    h1 = jnp.maximum(xa @ w1 + b1, 0.0)
    h2 = jnp.maximum(h1 @ w2 + b2, 0.0)
    return h2 @ w3 + b3


def reference_forward_bf16(x, a, params):
    """Reference using the same math as the kernel: bf16 MXU inputs with f32
    accumulation for fc1/fc2, f32 vector-reduce for fc3."""
    w1, b1, w2, b2, w3, b3 = params
    xa = jnp.concatenate([x, a], axis=1).astype(jnp.bfloat16)
    h1 = jnp.dot(xa, w1.astype(jnp.bfloat16),
                 preferred_element_type=jnp.float32) + b1
    h1 = jnp.maximum(h1, 0.0)
    h2 = jnp.dot(h1.astype(jnp.bfloat16), w2.astype(jnp.bfloat16),
                 preferred_element_type=jnp.float32) + b2
    h2 = jnp.maximum(h2, 0.0)
    return h2 @ w3 + b3        # fc3 stays in f32 (matches the kernel)


if __name__ == "__main__":
    # Small, synthetic env dimensions consistent with the module's __init__:
    # obs_dim + act_dim input features, hidden=256, scalar Q output.
    # batch=200 exercises a 2-step grid with a remainder (padded to 224).
    batch, obs_dim, act_dim, hidden = 200, 17, 6, 256

    key = jax.random.PRNGKey(0)
    k_x, k_a, k_p = jax.random.split(key, 3)

    params = init_params(k_p, obs_dim, act_dim, hidden)
    x = jax.random.normal(k_x, (batch, obs_dim), jnp.float32)
    a = jax.random.uniform(k_a, (batch, act_dim), jnp.float32, -1.0, 1.0)

    q = critic_forward(x, a, params)
    q = jax.block_until_ready(q)
    assert q.shape == (batch, 1)

    # Tight check vs. a reference doing identical bf16-input / f32-accum math.
    ref_bf16 = reference_forward_bf16(x, a, params)
    np.testing.assert_allclose(np.asarray(q), np.asarray(ref_bf16),
                               rtol=5e-3, atol=5e-3)
    # Loose check vs. the full-f32 PyTorch-equivalent reference.
    ref_f32 = reference_forward_f32(x, a, params)
    np.testing.assert_allclose(np.asarray(q), np.asarray(ref_f32),
                               rtol=5e-2, atol=5e-2)

    print("KERNEL_OK")
</pallas_src>

<mosaic_0001>
module attributes {stable_mosaic.version = 11 : i64} {
  func.func @critic_kernel(%arg0: i32, %arg1: memref<112x23xbf16, #tpu.memory_space<vmem>>, %arg2: memref<23x256xbf16, #tpu.memory_space<vmem>>, %arg3: memref<1x256xf32, #tpu.memory_space<vmem>>, %arg4: memref<256x256xbf16, #tpu.memory_space<vmem>>, %arg5: memref<1x256xf32, #tpu.memory_space<vmem>>, %arg6: memref<1x256xf32, #tpu.memory_space<vmem>>, %arg7: memref<1x1xf32, #tpu.memory_space<vmem>>, %arg8: memref<112x1xf32, #tpu.memory_space<vmem>>) attributes {dimension_semantics = [#tpu.dimension_semantics<parallel>], iteration_bounds = array<i64: 2>, scalar_prefetch = 0 : i64, scratch_operands = 0 : i64, tpu.core_type = #tpu.core_type<tc>, window_params = [{transform_indices = @transform_0, window_bounds = array<i64: 112, 23>}, {pipeline_mode = #tpu.pipeline_mode<synchronous>, transform_indices = @transform_1, window_bounds = array<i64: 23, 256>}, {pipeline_mode = #tpu.pipeline_mode<synchronous>, transform_indices = @transform_2, window_bounds = array<i64: 1, 256>}, {pipeline_mode = #tpu.pipeline_mode<synchronous>, transform_indices = @transform_3, window_bounds = array<i64: 256, 256>}, {pipeline_mode = #tpu.pipeline_mode<synchronous>, transform_indices = @transform_4, window_bounds = array<i64: 1, 256>}, {pipeline_mode = #tpu.pipeline_mode<synchronous>, transform_indices = @transform_5, window_bounds = array<i64: 1, 256>}, {pipeline_mode = #tpu.pipeline_mode<synchronous>, transform_indices = @transform_6, window_bounds = array<i64: 1, 1>}, {transform_indices = @transform_7, window_bounds = array<i64: 112, 1>}]} {
    %c0 = arith.constant 0 : index
    %c0_0 = arith.constant 0 : index
    %0 = vector.load %arg1[%c0, %c0_0] : memref<112x23xbf16, #tpu.memory_space<vmem>>, vector<112x23xbf16>
    %c0_1 = arith.constant 0 : index
    %c0_2 = arith.constant 0 : index
    %1 = vector.load %arg2[%c0_1, %c0_2] : memref<23x256xbf16, #tpu.memory_space<vmem>>, vector<23x256xbf16>
    %cst = arith.constant dense<0.000000e+00> : vector<112x256xf32>
    %2 = tpu.matmul %0, %1, %cst {dimension_numbers = #tpu.dot_dimension_numbers<[1], [0], [0], [1], [0, 0, 1, 1], [], []>} : vector<112x23xbf16>, vector<23x256xbf16>, vector<112x256xf32> -> vector<112x256xf32>
    %c0_3 = arith.constant 0 : index
    %c0_4 = arith.constant 0 : index
    %3 = vector.load %arg3[%c0_3, %c0_4] : memref<1x256xf32, #tpu.memory_space<vmem>>, vector<1x256xf32>
    %4 = vector.broadcast %3 : vector<1x256xf32> to vector<112x256xf32>
    %5 = arith.addf %2, %4 : vector<112x256xf32>
    %cst_5 = arith.constant 0.000000e+00 : f32
    %6 = vector.broadcast %cst_5 : f32 to vector<112x256xf32>
    %7 = arith.maximumf %5, %6 : vector<112x256xf32>
    %8 = arith.truncf %7 : vector<112x256xf32> to vector<112x256xbf16>
    %c0_6 = arith.constant 0 : index
    %c0_7 = arith.constant 0 : index
    %9 = vector.load %arg4[%c0_6, %c0_7] : memref<256x256xbf16, #tpu.memory_space<vmem>>, vector<256x256xbf16>
    %cst_8 = arith.constant dense<0.000000e+00> : vector<112x256xf32>
    %10 = tpu.matmul %8, %9, %cst_8 {dimension_numbers = #tpu.dot_dimension_numbers<[1], [0], [0], [1], [0, 0, 1, 1], [], []>} : vector<112x256xbf16>, vector<256x256xbf16>, vector<112x256xf32> -> vector<112x256xf32>
    %c0_9 = arith.constant 0 : index
    %c0_10 = arith.constant 0 : index
    %11 = vector.load %arg5[%c0_9, %c0_10] : memref<1x256xf32, #tpu.memory_space<vmem>>, vector<1x256xf32>
    %12 = vector.broadcast %11 : vector<1x256xf32> to vector<112x256xf32>
    %13 = arith.addf %10, %12 : vector<112x256xf32>
    %cst_11 = arith.constant 0.000000e+00 : f32
    %14 = vector.broadcast %cst_11 : f32 to vector<112x256xf32>
    %15 = arith.maximumf %13, %14 : vector<112x256xf32>
    %c0_12 = arith.constant 0 : index
    %c0_13 = arith.constant 0 : index
    %16 = vector.load %arg6[%c0_12, %c0_13] : memref<1x256xf32, #tpu.memory_space<vmem>>, vector<1x256xf32>
    %17 = vector.broadcast %16 : vector<1x256xf32> to vector<112x256xf32>
    %18 = arith.mulf %15, %17 : vector<112x256xf32>
    %cst_14 = arith.constant dense<0.000000e+00> : vector<112xf32>
    %19 = vector.multi_reduction <add>, %18, %cst_14 [1] : vector<112x256xf32> to vector<112xf32>
    %20 = vector.shape_cast %19 : vector<112xf32> to vector<112x1xf32>
    %c0_15 = arith.constant 0 : index
    %c0_16 = arith.constant 0 : index
    %21 = vector.load %arg7[%c0_15, %c0_16] : memref<1x1xf32, #tpu.memory_space<vmem>>, vector<1x1xf32>
    %22 = vector.broadcast %21 : vector<1x1xf32> to vector<112x1xf32>
    %23 = arith.addf %20, %22 : vector<112x1xf32>
    %c0_17 = arith.constant 0 : index
    %c0_18 = arith.constant 0 : index
    %24 = vector.load %arg8[%c0_17, %c0_18] : memref<112x1xf32, #tpu.memory_space<vmem>>, vector<112x1xf32>
    tpu.vector_store %arg8[%c0_17, %c0_18], %23 {strides = array<i32>} : memref<112x1xf32, #tpu.memory_space<vmem>>, vector<112x1xf32>,
    return
  }
  func.func @transform_0(%arg0: i32) -> (i32, i32) {
    %c0_i32 = arith.constant 0 : i32
    %c0_i32_0 = arith.constant 0 : i32
    return %arg0, %c0_i32 : i32, i32
  }
  func.func @transform_1(%arg0: i32) -> (i32, i32) {
    %c0_i32 = arith.constant 0 : i32
    %c0_i32_0 = arith.constant 0 : i32
    %c0_i32_1 = arith.constant 0 : i32
    return %c0_i32, %c0_i32_0 : i32, i32
  }
  func.func @transform_2(%arg0: i32) -> (i32, i32) {
    %c0_i32 = arith.constant 0 : i32
    %c0_i32_0 = arith.constant 0 : i32
    %c0_i32_1 = arith.constant 0 : i32
    return %c0_i32, %c0_i32_0 : i32, i32
  }
  func.func @transform_3(%arg0: i32) -> (i32, i32) {
    %c0_i32 = arith.constant 0 : i32
    %c0_i32_0 = arith.constant 0 : i32
    %c0_i32_1 = arith.constant 0 : i32
    return %c0_i32, %c0_i32_0 : i32, i32
  }
  func.func @transform_4(%arg0: i32) -> (i32, i32) {
    %c0_i32 = arith.constant 0 : i32
    %c0_i32_0 = arith.constant 0 : i32
    %c0_i32_1 = arith.constant 0 : i32
    return %c0_i32, %c0_i32_0 : i32, i32
  }
  func.func @transform_5(%arg0: i32) -> (i32, i32) {
    %c0_i32 = arith.constant 0 : i32
    %c0_i32_0 = arith.constant 0 : i32
    %c0_i32_1 = arith.constant 0 : i32
    return %c0_i32, %c0_i32_0 : i32, i32
  }
  func.func @transform_6(%arg0: i32) -> (i32, i32) {
    %c0_i32 = arith.constant 0 : i32
    %c0_i32_0 = arith.constant 0 : i32
    %c0_i32_1 = arith.constant 0 : i32
    return %c0_i32, %c0_i32_0 : i32, i32
  }
  func.func @transform_7(%arg0: i32) -> (i32, i32) {
    %c0_i32 = arith.constant 0 : i32
    %c0_i32_0 = arith.constant 0 : i32
    return %arg0, %c0_i32 : i32, i32
  }
}

</mosaic_0001>

<bundles_post_ra>
// kernel: tpu_custom_call.1
= control target key start
LH: loop header
LB: loop body
LE: loop exit
PB: predicated region body
PF: predicated region fallthrough
CT: control target
= control target key end

     0   :  { %s1582_s0 = inlined_call_operand.vmem [shape: bf16[224,23], index: 0, kind: input, shape index: {}]   ;;  %s1583_s1 = inlined_call_operand.vmem [shape: bf16[23,256], index: 1, kind: input, shape index: {}]   ;;  %s1584_s2 = inlined_call_operand.vmem [shape: f32[1,256], index: 2, kind: input, shape index: {}]   ;;  %s1585_s3 = inlined_call_operand.hbm [shape: bf16[256,256], index: 3, kind: input, shape index: {}]   ;;  %s1586_s4 = inlined_call_operand.vmem [shape: f32[1,256], index: 4, kind: input, shape index: {}]   ;;  %s1587_s5 = inlined_call_operand.vmem [shape: f32[1,256], index: 5, kind: input, shape index: {}]   ;;  %s1588_s6 = inlined_call_operand.<no memory space> [shape: f32[1,1], index: 6, kind: input, shape index: {}]   ;;  %s1589_s7 = inlined_call_operand.vmem [shape: f32[224,1], index: 7, kind: output, shape index: {}]  }
   0x1   :  { %v12_v0 = vstv %s1588_s6 }
   0x2   :  { %13 = vst [vmem:[#allocation2] sm:$0x1] %v12_v0 }
   0x3   :  { %14 = vsyncpa [#allocation4], 0  ;;  %s1342_s26 = smov 0  }
   0x4 LB: > { %s1077_s27 = sadd.s32 4294967295, %s1292_s26   ;;  %p1079_p0 = scmp.ge.s32.totalorder %s1292_s26, 1  ;;  %s1292_s26 = sphi %s1342_s26, %s20_s26  }
   0x5   : > { %p203_p1 = scmp.lt.s32.totalorder %s1292_s26, 3  ;;  %s1294_s28 = smov [#allocation3]  }
   0x6   : > { %s221_s29 = sshll.u32 %s1294_s28, 4  ;;  %p1356_p3 = scmp.eq.s32.totalorder %s1077_s27, 0  ;;  %s222_s29 = int_to_ptr.vmem [resolvable:$true] %s221_s29 }
   0x7   : > { %p1350_p2 = pnand %p1079_p0, %p203_p1  ;;  %s1254_s11 = scalar_lea.hbm %s1585_s3, 4096 }
   0x8   : > { %s1594_s30 = scalar_select %p1356_p3, 1, 0 }
   0x9   : > { %s1593_s6 = scalar_select %p1350_p2, 1, 0 }
   0xa   : > { %p1175_p4 = pneg %p1350_p2  ;;  %p1255_p6 = scmp.ne.s32.totalorder %s1585_s3, %s1254_s11 }
   0xb   : > { %p1261_p10 = scmp.lt.u32.totalorder %s1254_s11, %s1585_s3 }
   0xc   : > { %p1364_p5 = pnand %p1356_p3, %p1175_p4 }
   0xe   : > { %p1256_p7 = pneg %p1364_p5 }
  0x10   : > { %p1257_p8 = pnand %p1256_p7, %p1255_p6 }
  0x12   : > { %p1258_p9 = pneg %p1257_p8 }
  0x14   : > { %p1263_p11 = pnand %p1261_p10, %p1258_p9 }
  0x16   : > { %1266 = shalt.err (!%p1263_p11)
}
  0x17   : > { %s1267_s16 = scalar_lea.vmem %s222_s29, 4096  ;;  %p1275_p1 = scmp.lt.s32.totalorder %s222_s29, %s222_s29 }
  0x18   : > { %p1268_p12 = scmp.ne.s32.totalorder %s222_s29, %s1267_s16  ;;  %p1276_p4 = scmp.lt.s32.totalorder %s1267_s16, %s1267_s16 }
  0x1a   : > { %p1270_p13 = pnand %p1268_p12, %p1256_p7  ;;  %p1277_p3 = por %p1276_p4, %p1275_p1 }
  0x1c   : > { %p1271_p0 = pneg %p1270_p13 }
  0x1e   : > { %p1278_p2 = pnand %p1277_p3, %p1271_p0 }
  0x20   : > { %1281 = shalt.err (!%p1278_p2)
}
  0x21   : > { %s1295_s17 = smov 128   ;;  %s1296_s18 = smov 8  }
  0x22   : > { %1178 = dma.hbm_to_vmem [thread:$0]  (!%p1364_p5), %s1585_s3, 4096, %s222_s29, [#allocation4], %s1295_s17, %s1295_s17, %s1296_s18  }
  0x23   : > { %p1596_p6 = scmp.ne.s32.totalorder %s1593_s6, 0 }
  0x24   : > { %p1597_p8 = scmp.ne.s32.totalorder (!%p1596_p6), %s1594_s30, 0 }
  0x25   : > { %255 = sbr.rel (%p1596_p6) target bundleno = 693 (0x2b5), region = 48 }
  0x2c   : > { %1287 = dma.done.wait (%p1597_p8), [#allocation4], 4096  }
  0x2d   : > { %1289 = vsyncadd (%p1597_p8), [#allocation4], 4294963200  ;;  %v1297_v1 = vmov 0   ;;  %s287_s21 = smul.u32 14, %s1077_s27  ;;  %vm401_vm0 = vcmask 1042432   ;;  %vm402_vm1 = vcmask 1043456   ;;  %v319_v51 = vlaneseq }
  0x2e   : > { %443 = vmatprep.mubr.bf16.mxu0 %v1297_v1  ;;  %v1298_v2 = vmov 65535   ;;  %v1194_v4 = vld [vmem:[%s1583_s1 + $0x4] ss:$8 sps:$4 sm:$0xff]   ;;  %v1196_v5 = vld [vmem:[%s1583_s1] ss:$8 sps:$4 sm:$0xff]   ;;  %v316_v6 = vld [vmem:[%s1583_s1 + $0x10] sm:$0xff] }
  0x2f   : > { %p288_p2 = scmp.lt.s32.totalorder %s287_s21, 27  ;;  %v403_v3 = vsel %vm401_vm0, 4294967295, %v1298_v2  ;;  %411 = vmatprep.subr.bf16.mxu0 %v1194_v4  ;;  %v1096_v8 = vcombine.high %v316_v6, %v316_v6  ;;  %v1095_v9 = vcombine.low %v316_v6, %v316_v6  ;;  %vm379_vm2 = vcmask 187392   ;;  %v1206_v13 = vld [vmem:[#allocation3] ss:$8 sps:$4 sm:$0xff]  }
  0x30   : > { %v404_v7 = vsel %vm402_vm1, %v403_v3, 0  ;;  %412 = vmatpush1.bf16.msra.mxu0 %v1196_v5  ;;  %v1208_v14 = vld [vmem:[#allocation3 + $0x4] ss:$8 sps:$4 sm:$0xff]   ;;  %v1211_v15 = vld [vmem:[#allocation3 + $0x14] ss:$8 sps:$4 sm:$0xff]   ;;  %v320_v52 = vshrl.u32 %v319_v51, 7 }
  0x31   : > { %s1599_s21 = smov (!%p288_p2, %s287_s21), 27  ;;  %v409_v10 = vand.u32 %v1096_v8, %v404_v7  ;;  %v406_v11 = vand.u32 %v1095_v9, %v404_v7  ;;  %v1209_v16 = vld [vmem:[#allocation3 + $0x10] ss:$8 sps:$4 sm:$0xff]   ;;  %1139 = vmatprep.subr.bf16.mxu1 %v1208_v14  ;;  %v1214_v17 = vld [vmem:[#allocation3 + $0x24] ss:$8 sps:$4 sm:$0xff]   ;;  %vm994_vm3 = vcmask 7168  }
  0x32   : > { %s1084_s24 = sshll.u32 %s1599_s21, 2  ;;  %1155 = vmatpush1.bf16.msra.mxu1 %v1206_v13  ;;  %v1212_v19 = vld [vmem:[#allocation3 + $0x20] ss:$8 sps:$4 sm:$0xff]   ;;  %v1217_v20 = vld [vmem:[#allocation3 + $0x34] ss:$8 sps:$4 sm:$0xff]   ;;  %v1430_v53 = vsub.s32 0, %v320_v52 }
  0x33   : > { %s1408_s8 = scalar_lea.vmem %s1582_s0, %s1084_s24  ;;  %413 = vmatprep.subr.bf16.mxu0 %v409_v10  ;;  %1140 = vmatprep.subr.bf16.mxu1 %v1211_v15  ;;  %v1215_v21 = vld [vmem:[#allocation3 + $0x30] ss:$8 sps:$4 sm:$0xff]   ;;  %v1220_v22 = vld [vmem:[#allocation3 + $0x44] ss:$8 sps:$4 sm:$0xff]   ;;  %v1218_v24 = vld [vmem:[#allocation3 + $0x40] ss:$8 sps:$4 sm:$0xff]  }
  0x34   : > { %v1199_v12 = vld [vmem:[%s1408_s8] sm:$0xff]   ;;  %414 = vmatpush1.bf16.msra.mxu0 %v406_v11  ;;  %v1200_v18 = vld [vmem:[%s1408_s8 + $0x8] sm:$0xff]   ;;  %v1201_v23 = vld [vmem:[%s1408_s8 + $0x10] sm:$0xff]   ;;  %v1435_v55 = vsub.s32 1, %v320_v52  ;;  %s1085_s15 = sshll.u32 %s1599_s21, 3 }
  0x35   : > { %760 = vmatprep.subr.bf16.mxu0 %v1208_v14  ;;  %v1223_v25 = vld [vmem:[#allocation3 + $0x54] ss:$8 sps:$4 sm:$0xff]   ;;  %v1221_v26 = vld [vmem:[#allocation3 + $0x50] ss:$8 sps:$4 sm:$0xff]   ;;  %v1226_v27 = vld [vmem:[#allocation3 + $0x64] ss:$8 sps:$4 sm:$0xff]   ;;  %s1549_s18 = scalar_lea.vmem %s1589_s7, %s1085_s15 }
  0x36   : > { %1156 = vmatpush1.bf16.msra.mxu1 %v1209_v16  ;;  %v1202_v28 = vld [vmem:[%s1408_s8 + $0x18] sm:$0xff]   ;;  %v1224_v29 = vld [vmem:[#allocation3 + $0x60] ss:$8 sps:$4 sm:$0xff]   ;;  %v1232_v32 = vld [vmem:[#allocation3 + $0x84] ss:$8 sps:$4 sm:$0xff]  }
  0x37   : > { %1097 = vmatmul.mubr.msk.bf16.vlgmr.msra.gmra.mrb[0].mxu0 %vm379_vm2, %v1199_v12  ;;  %1141 = vmatprep.subr.bf16.mxu1 %v1214_v17  ;;  %v1229_v30 = vld [vmem:[#allocation3 + $0x74] ss:$8 sps:$4 sm:$0xff]   ;;  %v1227_v31 = vld [vmem:[#allocation3 + $0x70] ss:$8 sps:$4 sm:$0xff]   ;;  %v1230_v34 = vld [vmem:[#allocation3 + $0x80] ss:$8 sps:$4 sm:$0xff]  }
  0x38   : > { %453 = vmatprep.mubr.bf16.mxu0 %v1297_v1  ;;  %761 = vmatpush1.bf16.msra.mxu0 %v1206_v13  ;;  %v1203_v33 = vld [vmem:[%s1408_s8 + $0x20] sm:$0xff]   ;;  %v1233_v36 = vld [vmem:[#allocation3 + $0x90] ss:$8 sps:$4 sm:$0xff]   ;;  %v1204_v38 = vld [vmem:[%s1408_s8 + $0x28] sm:$0xff]  }
  0x39   : > { %762 = vmatprep.subr.bf16.mxu0 %v1211_v15  ;;  %v1235_v35 = vld [vmem:[#allocation3 + $0x94] ss:$8 sps:$4 sm:$0xff]   ;;  %v1238_v37 = vld [vmem:[#allocation3 + $0xa4] ss:$8 sps:$4 sm:$0xff]   ;;  %v1236_v39 = vld [vmem:[#allocation3 + $0xa0] ss:$8 sps:$4 sm:$0xff]  }
  0x3a   : > { %1157 = vmatpush1.bf16.msra.mxu1 %v1212_v19  ;;  %v1241_v40 = vld [vmem:[#allocation3 + $0xb4] ss:$8 sps:$4 sm:$0xff]   ;;  %v1239_v41 = vld [vmem:[#allocation3 + $0xb0] ss:$8 sps:$4 sm:$0xff]   ;;  %v1244_v42 = vld [vmem:[#allocation3 + $0xc4] ss:$8 sps:$4 sm:$0xff]  }
  0x3b   : > { %1142 = vmatprep.subr.bf16.mxu1 %v1217_v20  ;;  %v1205_v43 = vld [vmem:[%s1408_s8 + $0x30] sm:$0xff]   ;;  %v1242_v44 = vld [vmem:[#allocation3 + $0xc0] ss:$8 sps:$4 sm:$0xff]  }
  0x3c   : > { %763 = vmatpush1.bf16.msra.mxu0 %v1209_v16  ;;  %v1247_v45 = vld [vmem:[#allocation3 + $0xd4] ss:$8 sps:$4 sm:$0xff]   ;;  %v1245_v46 = vld [vmem:[#allocation3 + $0xd0] ss:$8 sps:$4 sm:$0xff]   ;;  %v1250_v47 = vld [vmem:[#allocation3 + $0xe4] ss:$8 sps:$4 sm:$0xff]  }
  0x3d   : > { %764 = vmatprep.subr.bf16.mxu0 %v1214_v17  ;;  %v1248_v48 = vld [vmem:[#allocation3 + $0xe0] ss:$8 sps:$4 sm:$0xff]   ;;  %v1253_v49 = vld [vmem:[#allocation3 + $0xf4] ss:$8 sps:$4 sm:$0xff]   ;;  %v1251_v50 = vld [vmem:[#allocation3 + $0xf0] ss:$8 sps:$4 sm:$0xff]  }
  0x3e   : > { %1158 = vmatpush1.bf16.msra.mxu1 %v1215_v21  ;;  %v317_v54 = vld [vmem:[%s1584_s2] sm:$0x3] }
  0x3f   : > { %1098 = vmatmul.mubr.msk.bf16.gmra.mrb[4].mxu0 %vm379_vm2, %v1200_v18  ;;  %1143 = vmatprep.subr.bf16.mxu1 %v1220_v22  ;;  %v1438_v56 = vrot.slane %v317_v54, %v1430_v53  ;;  %v1441_v57 = vrot.slane %v317_v54, %v1435_v55 }
  0x40   : > { %463 = vmatprep.mubr.bf16.mxu0 %v1297_v1  ;;  %765 = vmatpush1.bf16.msra.mxu0 %v1212_v19 }
  0x41   : > { %766 = vmatprep.subr.bf16.mxu0 %v1217_v20 }
  0x42   : > { %1159 = vmatpush1.bf16.msra.mxu1 %v1218_v24 }
  0x43   : > { %1144 = vmatprep.subr.bf16.mxu1 %v1223_v25 }
  0x44   : > { %767 = vmatpush1.bf16.msra.mxu0 %v1215_v21 }
  0x45   : > { %768 = vmatprep.subr.bf16.mxu0 %v1220_v22 }
  0x46   : > { %1160 = vmatpush1.bf16.msra.mxu1 %v1221_v26 }
  0x47   : > { %1099 = vmatmul.mubr.msk.bf16.gmra.mrb[8].mxu0 %vm379_vm2, %v1201_v23  ;;  %1145 = vmatprep.subr.bf16.mxu1 %v1226_v27 }
  0x48   : > { %473 = vmatprep.mubr.bf16.mxu0 %v1297_v1  ;;  %769 = vmatpush1.bf16.msra.mxu0 %v1218_v24 }
  0x49   : > { %770 = vmatprep.subr.bf16.mxu0 %v1223_v25 }
  0x4a   : > { %1161 = vmatpush1.bf16.msra.mxu1 %v1224_v29 }
  0x4b   : > { %1146 = vmatprep.subr.bf16.mxu1 %v1229_v30 }
  0x4c   : > { %771 = vmatpush1.bf16.msra.mxu0 %v1221_v26 }
  0x4d   : > { %772 = vmatprep.subr.bf16.mxu0 %v1226_v27 }
  0x4e   : > { %1162 = vmatpush1.bf16.msra.mxu1 %v1227_v31 }
  0x4f   : > { %1100 = vmatmul.mubr.msk.bf16.gmra.mrb[12].mxu0 %vm379_vm2, %v1202_v28  ;;  %1147 = vmatprep.subr.bf16.mxu1 %v1232_v32 }
  0x50   : > { %483 = vmatprep.mubr.bf16.mxu0 %v1297_v1  ;;  %773 = vmatpush1.bf16.msra.mxu0 %v1224_v29 }
  0x51   : > { %774 = vmatprep.subr.bf16.mxu0 %v1229_v30 }
  0x52   : > { %1163 = vmatpush1.bf16.msra.mxu1 %v1230_v34 }
  0x53   : > { %1148 = vmatprep.subr.bf16.mxu1 %v1235_v35 }
  0x54   : > { %775 = vmatpush1.bf16.msra.mxu0 %v1227_v31 }
  0x55   : > { %776 = vmatprep.subr.bf16.mxu0 %v1232_v32 }
  0x56   : > { %1164 = vmatpush1.bf16.msra.mxu1 %v1233_v36 }
  0x57   : > { %1101 = vmatmul.mubr.msk.bf16.gmra.mrb[16].mxu0 %vm379_vm2, %v1203_v33  ;;  %1149 = vmatprep.subr.bf16.mxu1 %v1238_v37 }
  0x58   : > { %493 = vmatprep.mubr.bf16.mxu0 %v1297_v1  ;;  %777 = vmatpush1.bf16.msra.mxu0 %v1230_v34 }
  0x59   : > { %778 = vmatprep.subr.bf16.mxu0 %v1235_v35 }
  0x5a   : > { %1165 = vmatpush1.bf16.msra.mxu1 %v1236_v39 }
  0x5b   : > { %1150 = vmatprep.subr.bf16.mxu1 %v1241_v40 }
  0x5c   : > { %779 = vmatpush1.bf16.msra.mxu0 %v1233_v36 }
  0x5d   : > { %780 = vmatprep.subr.bf16.mxu0 %v1238_v37 }
  0x5e   : > { %1166 = vmatpush1.bf16.msra.mxu1 %v1239_v41 }
  0x5f   : > { %1102 = vmatmul.mubr.msk.bf16.gmra.mrb[20].mxu0 %vm379_vm2, %v1204_v38  ;;  %1151 = vmatprep.subr.bf16.mxu1 %v1244_v42 }
  0x60   : > { %503 = vmatprep.mubr.bf16.mxu0 %v1297_v1  ;;  %781 = vmatpush1.bf16.msra.mxu0 %v1236_v39 }
  0x61   : > { %782 = vmatprep.subr.bf16.mxu0 %v1241_v40 }
  0x62   : > { %1167 = vmatpush1.bf16.msra.mxu1 %v1242_v44 }
  0x63   : > { %1152 = vmatprep.subr.bf16.mxu1 %v1247_v45 }
  0x64   : > { %783 = vmatpush1.bf16.msra.mxu0 %v1239_v41 }
  0x65   : > { %784 = vmatprep.subr.bf16.mxu0 %v1244_v42 }
  0x66   : > { %1168 = vmatpush1.bf16.msra.mxu1 %v1245_v46 }
  0x67   : > { %1103 = vmatmul.mubr.msk.bf16.gmra.mrb[24].mxu0 %vm379_vm2, %v1205_v43  ;;  %1153 = vmatprep.subr.bf16.mxu1 %v1250_v47 }
  0x68   : > { %785 = vmatpush1.bf16.msra.mxu0 %v1242_v44 }
  0x69   : > { %786 = vmatprep.subr.bf16.mxu0 %v1247_v45 }
  0x6a   : > { %1169 = vmatpush1.bf16.msra.mxu1 %v1248_v48 }
  0x6b   : > { %1154 = vmatprep.subr.bf16.mxu1 %v1253_v49 }
  0x6c   : > { %787 = vmatpush1.bf16.msra.mxu0 %v1245_v46 }
  0x6d   : > { %788 = vmatprep.subr.bf16.mxu0 %v1250_v47 }
  0x6e   : > { %1170 = vmatpush1.bf16.msra.mxu1 %v1251_v50 }
  0x70   : > { %789 = vmatpush1.bf16.msra.mxu0 %v1248_v48 }
  0x71   : > { %790 = vmatprep.subr.bf16.mxu0 %v1253_v49 }
  0x74   : > { %791 = vmatpush1.bf16.msra.mxu0 %v1251_v50 }
 0x10a   : > { %v445_v58 = vpop.f32.mrb[0].mxu0 }
 0x10b   : > { %v446_v59 = vadd.f32 %v445_v58, %v1438_v56  ;;  %v447_v60 = vpop.f32.mrb[1].mxu0 }
 0x10c   : > { %v448_v61 = vadd.f32 %v447_v60, %v1441_v57  ;;  %v449_v62 = vpop.f32.mrb[2].mxu0 }
 0x10d   : > { %v450_v63 = vadd.f32 %v449_v62, %v1438_v56  ;;  %v451_v0 = vpop.f32.mrb[3].mxu0  ;;  %v514_v2 = vmax.f32 %v446_v59, 0.0 }
 0x10e   : > { %v452_v1 = vadd.f32 %v451_v0, %v1441_v57  ;;  %v515_v4 = vmax.f32 %v448_v61, 0.0 }
 0x10f   : > { %v516_v3 = vmax.f32 %v450_v63, 0.0 }
 0x110   : > { %v517_v5 = vmax.f32 %v452_v1, 0.0 }
 0x111   : > { %v542_v6 = vpack.c.bf16 %v516_v3, %v514_v2 }
 0x112   : > { %v543_v7 = vpack.c.bf16 %v517_v5, %v515_v4  ;;  %v455_v8 = vpop.f32.mrb[4].mxu0 }
 0x113   : > { %v456_v9 = vadd.f32 %v455_v8, %v1438_v56  ;;  %v457_v10 = vpop.f32.mrb[5].mxu0 }
 0x114   : > { %v458_v11 = vadd.f32 %v457_v10, %v1441_v57  ;;  %v459_v12 = vpop.f32.mrb[6].mxu0  ;;  %792 = vmatprep.mubr.bf16.mxu0 %v543_v7 }
 0x115   : > { %v460_v13 = vadd.f32 %v459_v12, %v1438_v56  ;;  %v461_v14 = vpop.f32.mrb[7].mxu0  ;;  %793 = vmatmul.mubr.bf16.vlgmr.msra.gmra.mrb[28].mxu0 %v542_v6  ;;  %v518_v16 = vmax.f32 %v456_v9, 0.0 }
 0x116   : > { %v462_v15 = vadd.f32 %v461_v14, %v1441_v57  ;;  %v519_v18 = vmax.f32 %v458_v11, 0.0 }
 0x117   : > { %v520_v17 = vmax.f32 %v460_v13, 0.0 }
 0x118   : > { %v521_v19 = vmax.f32 %v462_v15, 0.0 }
 0x119   : > { %v544_v20 = vpack.c.bf16 %v520_v17, %v518_v16 }
 0x11a   : > { %v545_v21 = vpack.c.bf16 %v521_v19, %v519_v18  ;;  %v465_v22 = vpop.f32.mrb[8].mxu0 }
 0x11b   : > { %v466_v23 = vadd.f32 %v465_v22, %v1438_v56  ;;  %v467_v24 = vpop.f32.mrb[9].mxu0 }
 0x11c   : > { %v468_v25 = vadd.f32 %v467_v24, %v1441_v57  ;;  %v469_v26 = vpop.f32.mrb[10].mxu0  ;;  %802 = vmatprep.mubr.bf16.mxu0 %v545_v21 }
 0x11d   : > { %v470_v27 = vadd.f32 %v469_v26, %v1438_v56  ;;  %v471_v28 = vpop.f32.mrb[11].mxu0  ;;  %803 = vmatmul.mubr.bf16.gmra.mrb[32].mxu0 %v544_v20  ;;  %v522_v30 = vmax.f32 %v466_v23, 0.0 }
 0x11e   : > { %v472_v29 = vadd.f32 %v471_v28, %v1441_v57  ;;  %v523_v32 = vmax.f32 %v468_v25, 0.0 }
 0x11f   : > { %v524_v31 = vmax.f32 %v470_v27, 0.0 }
 0x120   : > { %v525_v33 = vmax.f32 %v472_v29, 0.0 }
 0x121   : > { %v546_v34 = vpack.c.bf16 %v524_v31, %v522_v30 }
 0x122   : > { %v547_v35 = vpack.c.bf16 %v525_v33, %v523_v32  ;;  %v475_v36 = vpop.f32.mrb[12].mxu0  ;;  %v588_v32 = vld [vmem:[%s1586_s4] sm:$0x3] }
 0x123   : > { %v476_v37 = vadd.f32 %v475_v36, %v1438_v56  ;;  %v477_v38 = vpop.f32.mrb[13].mxu0  ;;  %v1475_v33 = vrot.slane %v588_v32, %v1430_v53 }
 0x124   : > { %v478_v39 = vadd.f32 %v477_v38, %v1441_v57  ;;  %v479_v40 = vpop.f32.mrb[14].mxu0  ;;  %812 = vmatprep.mubr.bf16.mxu0 %v547_v35 }
 0x125   : > { %v480_v41 = vadd.f32 %v479_v40, %v1438_v56  ;;  %v481_v42 = vpop.f32.mrb[15].mxu0  ;;  %813 = vmatmul.mubr.bf16.gmra.mrb[36].mxu0 %v546_v34  ;;  %v526_v44 = vmax.f32 %v476_v37, 0.0 }
 0x126   : > { %v482_v43 = vadd.f32 %v481_v42, %v1441_v57  ;;  %v527_v46 = vmax.f32 %v478_v39, 0.0 }
 0x127   : > { %v528_v45 = vmax.f32 %v480_v41, 0.0 }
 0x128   : > { %v529_v47 = vmax.f32 %v482_v43, 0.0 }
 0x129   : > { %v548_v48 = vpack.c.bf16 %v528_v45, %v526_v44 }
 0x12a   : > { %v485_v49 = vpop.f32.mrb[16].mxu0  ;;  %v549_v50 = vpack.c.bf16 %v529_v47, %v527_v46 }
 0x12b   : > { %v486_v51 = vadd.f32 %v485_v49, %v1438_v56  ;;  %v487_v52 = vpop.f32.mrb[17].mxu0 }
 0x12c   : > { %v488_v54 = vadd.f32 %v487_v52, %v1441_v57  ;;  %v489_v58 = vpop.f32.mrb[18].mxu0  ;;  %822 = vmatprep.mubr.bf16.mxu1 %v549_v50 }
 0x12d   : > { %v490_v59 = vadd.f32 %v489_v58, %v1438_v56  ;;  %v491_v60 = vpop.f32.mrb[19].mxu0  ;;  %823 = vmatmul.mubr.bf16.vlgmr.msra.gmra.mrb[0].mxu1 %v548_v48  ;;  %v530_v62 = vmax.f32 %v486_v51, 0.0 }
 0x12e   : > { %v492_v61 = vadd.f32 %v491_v60, %v1441_v57  ;;  %v531_v0 = vmax.f32 %v488_v54, 0.0 }
 0x12f   : > { %v532_v63 = vmax.f32 %v490_v59, 0.0 }
 0x130   : > { %v533_v1 = vmax.f32 %v492_v61, 0.0 }
 0x131   : > { %v550_v2 = vpack.c.bf16 %v532_v63, %v530_v62 }
 0x132   : > { %v551_v3 = vpack.c.bf16 %v533_v1, %v531_v0  ;;  %v495_v4 = vpop.f32.mrb[20].mxu0 }
 0x133   : > { %v496_v5 = vadd.f32 %v495_v4, %v1438_v56  ;;  %v497_v6 = vpop.f32.mrb[21].mxu0 }
 0x134   : > { %v498_v7 = vadd.f32 %v497_v6, %v1441_v57  ;;  %v499_v8 = vpop.f32.mrb[22].mxu0  ;;  %832 = vmatprep.mubr.bf16.mxu1 %v551_v3 }
 0x135   : > { %v500_v9 = vadd.f32 %v499_v8, %v1438_v56  ;;  %v501_v10 = vpop.f32.mrb[23].mxu0  ;;  %833 = vmatmul.mubr.bf16.gmra.mrb[4].mxu1 %v550_v2  ;;  %v534_v12 = vmax.f32 %v496_v5, 0.0 }
 0x136   : > { %v502_v11 = vadd.f32 %v501_v10, %v1441_v57  ;;  %v535_v14 = vmax.f32 %v498_v7, 0.0 }
 0x137   : > { %v536_v13 = vmax.f32 %v500_v9, 0.0 }
 0x138   : > { %v537_v15 = vmax.f32 %v502_v11, 0.0 }
 0x139   : > { %v552_v16 = vpack.c.bf16 %v536_v13, %v534_v12 }
 0x13a   : > { %v553_v17 = vpack.c.bf16 %v537_v15, %v535_v14  ;;  %v505_v18 = vpop.f32.mrb[24].mxu0 }
 0x13b   : > { %v506_v19 = vadd.f32 %v505_v18, %v1438_v56  ;;  %v507_v20 = vpop.f32.mrb[25].mxu0 }
 0x13c   : > { %v508_v21 = vadd.f32 %v507_v20, %v1441_v57  ;;  %v509_v22 = vpop.f32.mrb[26].mxu0  ;;  %842 = vmatprep.mubr.bf16.mxu1 %v553_v17 }
 0x13d   : > { %v510_v23 = vadd.f32 %v509_v22, %v1438_v56  ;;  %v511_v24 = vpop.f32.mrb[27].mxu0  ;;  %843 = vmatmul.mubr.bf16.gmra.mrb[8].mxu1 %v552_v16  ;;  %v538_v26 = vmax.f32 %v506_v19, 0.0  ;;  %v1478_v56 = vrot.slane %v588_v32, %v1435_v55 }
 0x13e   : > { %v512_v25 = vadd.f32 %v511_v24, %v1441_v57  ;;  %v539_v28 = vmax.f32 %v508_v21, 0.0  ;;  %v891_v57 = vld [vmem:[%s1587_s5] sm:$0x3] }
 0x13f   : > { %v540_v27 = vmax.f32 %v510_v23, 0.0  ;;  %v1485_v37 = vrot.slane %v891_v57, %v1430_v53  ;;  %v1489_v40 = vrot.slane %v891_v57, %v1435_v55 }
 0x140   : > { %v541_v29 = vmax.f32 %v512_v25, 0.0 }
 0x141   : > { %v554_v30 = vpack.c.bf16 %v540_v27, %v538_v26 }
 0x142   : > { %v555_v31 = vpack.c.bf16 %v541_v29, %v539_v28 }
 0x144   : > { %852 = vmatprep.mubr.bf16.mxu1 %v555_v31 }
 0x145   : > { %853 = vmatmul.mubr.bf16.gmra.mrb[12].mxu1 %v554_v30 }
 0x1e8   : > { %v794_v34 = vpop.f32.mrb[28].mxu0 }
 0x1e9   : > { %v795_v35 = vadd.f32 %v794_v34, %v1475_v33  ;;  %v796_v36 = vpop.f32.mrb[29].mxu0 }
 0x1ea   : > { %v797_v38 = vadd.f32 %v796_v36, %v1478_v56  ;;  %v798_v39 = vpop.f32.mrb[30].mxu0 }
 0x1eb   : > { %v863_v41 = vmax.f32 %v795_v35, 0.0  ;;  %v799_v42 = vadd.f32 %v798_v39, %v1475_v33  ;;  %v800_v43 = vpop.f32.mrb[31].mxu0 }
 0x1ec   : > { %v864_v44 = vmax.f32 %v797_v38, 0.0  ;;  %v801_v45 = vadd.f32 %v800_v43, %v1478_v56 }
 0x1ed   : > { %v865_v46 = vmax.f32 %v799_v42, 0.0  ;;  %v903_v47 = vmul.f32 %v1485_v37, %v863_v41 }
 0x1ee   : > { %v866_v48 = vmax.f32 %v801_v45, 0.0  ;;  %v904_v53 = vmul.f32 %v1489_v40, %v864_v44 }
 0x1ef   : > { %v905_v49 = vmul.f32 %v1485_v37, %v865_v46 }
 0x1f0   : > { %v906_v50 = vmul.f32 %v1489_v40, %v866_v48  ;;  %v804_v51 = vpop.f32.mrb[32].mxu0  ;;  %v931_v55 = vadd.f32 %v904_v53, %v903_v47 }
 0x1f1   : > { %v805_v52 = vadd.f32 %v804_v51, %v1475_v33  ;;  %v806_v54 = vpop.f32.mrb[33].mxu0 }
 0x1f2   : > { %v807_v58 = vadd.f32 %v806_v54, %v1478_v56  ;;  %v808_v59 = vpop.f32.mrb[34].mxu0  ;;  %932 = vadd.xlane.f32.xlu0 %v931_v55  ;;  %v934_v60 = vadd.f32 %v906_v50, %v905_v49 }
 0x1f3   : > { %v867_v61 = vmax.f32 %v805_v52, 0.0  ;;  %v809_v62 = vadd.f32 %v808_v59, %v1475_v33  ;;  %v810_v63 = vpop.f32.mrb[35].mxu0 }
 0x1f4   : > { %v868_v0 = vmax.f32 %v807_v58, 0.0  ;;  %v811_v1 = vadd.f32 %v810_v63, %v1478_v56 }
 0x1f5   : > { %v869_v2 = vmax.f32 %v809_v62, 0.0  ;;  %v907_v3 = vmul.f32 %v1485_v37, %v867_v61 }
 0x1f6   : > { %v870_v4 = vmax.f32 %v811_v1, 0.0  ;;  %935 = vadd.xlane.f32.xlu0 %v934_v60  ;;  %v908_v5 = vmul.f32 %v1489_v40, %v868_v0 }
 0x1f7   : > { %v909_v6 = vmul.f32 %v1485_v37, %v869_v2 }
 0x1f8   : > { %v910_v7 = vmul.f32 %v1489_v40, %v870_v4  ;;  %v814_v8 = vpop.f32.mrb[36].mxu0  ;;  %v937_v9 = vadd.f32 %v908_v5, %v907_v3 }
 0x1f9   : > { %v815_v10 = vadd.f32 %v814_v8, %v1475_v33  ;;  %v816_v11 = vpop.f32.mrb[37].mxu0 }
 0x1fa   : > { %v817_v12 = vadd.f32 %v816_v11, %v1478_v56  ;;  %v818_v13 = vpop.f32.mrb[38].mxu0  ;;  %938 = vadd.xlane.f32.xlu1 %v937_v9  ;;  %v940_v14 = vadd.f32 %v910_v7, %v909_v6 }
 0x1fb   : > { %v871_v15 = vmax.f32 %v815_v10, 0.0  ;;  %v819_v16 = vadd.f32 %v818_v13, %v1475_v33  ;;  %v820_v17 = vpop.f32.mrb[39].mxu0 }
 0x1fc   : > { %v872_v18 = vmax.f32 %v817_v12, 0.0  ;;  %v821_v19 = vadd.f32 %v820_v17, %v1478_v56 }
 0x1fd   : > { %v911_v20 = vmul.f32 %v1485_v37, %v871_v15  ;;  %v873_v21 = vmax.f32 %v819_v16, 0.0 }
 0x1fe   : > { %v912_v22 = vmul.f32 %v1489_v40, %v872_v18  ;;  %v874_v23 = vmax.f32 %v821_v19, 0.0  ;;  %941 = vadd.xlane.f32.xlu1 %v940_v14 }
 0x1ff   : > { %v913_v24 = vmul.f32 %v1485_v37, %v873_v21 }
 0x200   : > { %v914_v25 = vmul.f32 %v1489_v40, %v874_v23  ;;  %v824_v26 = vpop.f32.mrb[0].mxu1  ;;  %v943_v27 = vadd.f32 %v912_v22, %v911_v20 }
 0x201   : > { %v825_v28 = vadd.f32 %v824_v26, %v1475_v33  ;;  %v826_v29 = vpop.f32.mrb[1].mxu1 }
 0x202   : > { %v827_v30 = vadd.f32 %v826_v29, %v1478_v56  ;;  %v828_v31 = vpop.f32.mrb[2].mxu1  ;;  %944 = vadd.xlane.f32.xlu0 %v943_v27  ;;  %v946_v32 = vadd.f32 %v914_v25, %v913_v24 }
 0x203   : > { %v875_v57 = vmax.f32 %v825_v28, 0.0  ;;  %v829_v34 = vadd.f32 %v828_v31, %v1475_v33  ;;  %v830_v35 = vpop.f32.mrb[3].mxu1 }
 0x204   : > { %v876_v36 = vmax.f32 %v827_v30, 0.0  ;;  %v831_v38 = vadd.f32 %v830_v35, %v1478_v56  ;;  %947 = vadd.xlane.f32.xlu1 %v946_v32 }
 0x205   : > { %v915_v39 = vmul.f32 %v1485_v37, %v875_v57  ;;  %v877_v41 = vmax.f32 %v829_v34, 0.0 }
 0x206   : > { %v916_v42 = vmul.f32 %v1489_v40, %v876_v36  ;;  %v878_v43 = vmax.f32 %v831_v38, 0.0 }
 0x207   : > { %v917_v44 = vmul.f32 %v1485_v37, %v877_v41 }
 0x208   : > { %v918_v45 = vmul.f32 %v1489_v40, %v878_v43  ;;  %v834_v46 = vpop.f32.mrb[4].mxu1  ;;  %v949_v47 = vadd.f32 %v916_v42, %v915_v39 }
 0x209   : > { %v835_v48 = vadd.f32 %v834_v46, %v1475_v33  ;;  %v836_v53 = vpop.f32.mrb[5].mxu1 }
 0x20a   : > { %v837_v49 = vadd.f32 %v836_v53, %v1478_v56  ;;  %v838_v50 = vpop.f32.mrb[6].mxu1  ;;  %950 = vadd.xlane.f32.xlu0 %v949_v47  ;;  %v952_v51 = vadd.f32 %v918_v45, %v917_v44 }
 0x20b   : > { %v879_v55 = vmax.f32 %v835_v48, 0.0  ;;  %v839_v52 = vadd.f32 %v838_v50, %v1475_v33  ;;  %v840_v54 = vpop.f32.mrb[7].mxu1 }
 0x20c   : > { %v880_v58 = vmax.f32 %v837_v49, 0.0  ;;  %v841_v59 = vadd.f32 %v840_v54, %v1478_v56  ;;  %953 = vadd.xlane.f32.xlu1 %v952_v51 }
 0x20d   : > { %v919_v60 = vmul.f32 %v1485_v37, %v879_v55  ;;  %v881_v61 = vmax.f32 %v839_v52, 0.0 }
 0x20e   : > { %v920_v62 = vmul.f32 %v1489_v40, %v880_v58  ;;  %v882_v63 = vmax.f32 %v841_v59, 0.0 }
 0x20f   : > { %v921_v0 = vmul.f32 %v1485_v37, %v881_v61 }
 0x210   : > { %v922_v1 = vmul.f32 %v1489_v40, %v882_v63  ;;  %v844_v2 = vpop.f32.mrb[8].mxu1  ;;  %v955_v3 = vadd.f32 %v920_v62, %v919_v60 }
 0x211   : > { %v845_v4 = vadd.f32 %v844_v2, %v1475_v33  ;;  %v846_v5 = vpop.f32.mrb[9].mxu1 }
 0x212   : > { %v847_v6 = vadd.f32 %v846_v5, %v1478_v56  ;;  %v848_v7 = vpop.f32.mrb[10].mxu1  ;;  %956 = vadd.xlane.f32.xlu0 %v955_v3  ;;  %v958_v8 = vadd.f32 %v922_v1, %v921_v0 }
 0x213   : > { %v883_v9 = vmax.f32 %v845_v4, 0.0  ;;  %v849_v10 = vadd.f32 %v848_v7, %v1475_v33  ;;  %v850_v11 = vpop.f32.mrb[11].mxu1 }
 0x214   : > { %v884_v12 = vmax.f32 %v847_v6, 0.0  ;;  %v851_v13 = vadd.f32 %v850_v11, %v1478_v56  ;;  %959 = vadd.xlane.f32.xlu1 %v958_v8 }
 0x215   : > { %v923_v14 = vmul.f32 %v1485_v37, %v883_v9  ;;  %v885_v15 = vmax.f32 %v849_v10, 0.0 }
 0x216   : > { %v924_v16 = vmul.f32 %v1489_v40, %v884_v12  ;;  %v886_v17 = vmax.f32 %v851_v13, 0.0 }
 0x217   : > { %v925_v18 = vmul.f32 %v1485_v37, %v885_v15 }
 0x218   : > { %v926_v19 = vmul.f32 %v1489_v40, %v886_v17  ;;  %v854_v20 = vpop.f32.mrb[12].mxu1  ;;  %v961_v21 = vadd.f32 %v924_v16, %v923_v14 }
 0x219   : > { %v855_v22 = vadd.f32 %v854_v20, %v1475_v33  ;;  %v856_v23 = vpop.f32.mrb[13].mxu1 }
 0x21a   : > { %v857_v24 = vadd.f32 %v856_v23, %v1478_v56  ;;  %v858_v25 = vpop.f32.mrb[14].mxu1  ;;  %962 = vadd.xlane.f32.xlu0 %v961_v21  ;;  %v964_v26 = vadd.f32 %v926_v19, %v925_v18 }
 0x21b   : > { %v887_v27 = vmax.f32 %v855_v22, 0.0  ;;  %v859_v28 = vadd.f32 %v858_v25, %v1475_v33  ;;  %v860_v29 = vpop.f32.mrb[15].mxu1  ;;  %v1136_v33 = vld [vmem:[#allocation2] ss:$0 sm:$0xff] }
 0x21c   : > { %v888_v30 = vmax.f32 %v857_v24, 0.0  ;;  %v861_v31 = vadd.f32 %v860_v29, %v1478_v56  ;;  %965 = vadd.xlane.f32.xlu1 %v964_v26 }
 0x21d   : > { %v927_v32 = vmul.f32 %v1485_v37, %v887_v27  ;;  %v889_v57 = vmax.f32 %v859_v28, 0.0 }
 0x21e   : > { %v928_v34 = vmul.f32 %v1489_v40, %v888_v30  ;;  %v890_v35 = vmax.f32 %v861_v31, 0.0 }
 0x21f   : > { %v929_v36 = vmul.f32 %v1485_v37, %v889_v57 }
 0x220   : > { %v930_v38 = vmul.f32 %v1489_v40, %v890_v35  ;;  %v967_v39 = vadd.f32 %v928_v34, %v927_v32 }
 0x222   : > { %968 = vadd.xlane.f32.xlu0 %v967_v39  ;;  %v970_v41 = vadd.f32 %v930_v38, %v929_v36 }
 0x224   : > { %971 = vadd.xlane.f32.xlu1 %v970_v41 }
 0x27f   : > { %v933_v56 = vpop.xlane.xlu0 %932 }
 0x280   : > { %v980_v37 = vadd.f32 %v1136_v33, %v933_v56 }
 0x282   : > { %995 = vst.msk [vmem:[%s1549_s18] sm:$0xff] %vm994_vm3, %v980_v37 }
 0x283   : > { %v936_v40 = vpop.xlane.xlu0 %935 }
 0x284   : > { %v981_v42 = vadd.f32 %v1136_v33, %v936_v40 }
 0x286   : > { %996 = vst.msk [vmem:[%s1549_s18 + $0x8] sm:$0xff] %vm994_vm3, %v981_v42 }
 0x287   : > { %v939_v43 = vpop.xlane.xlu1 %938 }
 0x288   : > { %v982_v44 = vadd.f32 %v1136_v33, %v939_v43 }
 0x28a   : > { %997 = vst.msk [vmem:[%s1549_s18 + $0x10] sm:$0xff] %vm994_vm3, %v982_v44 }
 0x28b   : > { %v942_v45 = vpop.xlane.xlu1 %941 }
 0x28c   : > { %v983_v46 = vadd.f32 %v1136_v33, %v942_v45 }
 0x28e   : > { %998 = vst.msk [vmem:[%s1549_s18 + $0x18] sm:$0xff] %vm994_vm3, %v983_v46 }
 0x28f   : > { %v945_v47 = vpop.xlane.xlu0 %944 }
 0x290   : > { %v984_v48 = vadd.f32 %v1136_v33, %v945_v47 }
 0x291   : > { %v948_v53 = vpop.xlane.xlu1 %947 }
 0x292   : > { %999 = vst.msk [vmem:[%s1549_s18 + $0x20] sm:$0xff] %vm994_vm3, %v984_v48  ;;  %v985_v49 = vadd.f32 %v1136_v33, %v948_v53 }
 0x294   : > { %1000 = vst.msk [vmem:[%s1549_s18 + $0x28] sm:$0xff] %vm994_vm3, %v985_v49 }
 0x297   : > { %v951_v50 = vpop.xlane.xlu0 %950 }
 0x298   : > { %v986_v51 = vadd.f32 %v1136_v33, %v951_v50 }
 0x299   : > { %v954_v55 = vpop.xlane.xlu1 %953 }
 0x29a   : > { %1001 = vst.msk [vmem:[%s1549_s18 + $0x30] sm:$0xff] %vm994_vm3, %v986_v51  ;;  %v987_v52 = vadd.f32 %v1136_v33, %v954_v55 }
 0x29c   : > { %1002 = vst.msk [vmem:[%s1549_s18 + $0x38] sm:$0xff] %vm994_vm3, %v987_v52 }
 0x29f   : > { %v957_v54 = vpop.xlane.xlu0 %956 }
 0x2a0   : > { %v988_v58 = vadd.f32 %v1136_v33, %v957_v54 }
 0x2a1   : > { %v960_v59 = vpop.xlane.xlu1 %959 }
 0x2a2   : > { %1003 = vst.msk [vmem:[%s1549_s18 + $0x40] sm:$0xff] %vm994_vm3, %v988_v58  ;;  %v989_v60 = vadd.f32 %v1136_v33, %v960_v59 }
 0x2a4   : > { %1004 = vst.msk [vmem:[%s1549_s18 + $0x48] sm:$0xff] %vm994_vm3, %v989_v60 }
 0x2a7   : > { %v963_v61 = vpop.xlane.xlu0 %962 }
 0x2a8   : > { %v990_v62 = vadd.f32 %v1136_v33, %v963_v61 }
 0x2a9   : > { %v966_v63 = vpop.xlane.xlu1 %965 }
 0x2aa   : > { %1005 = vst.msk [vmem:[%s1549_s18 + $0x50] sm:$0xff] %vm994_vm3, %v990_v62  ;;  %v991_v0 = vadd.f32 %v1136_v33, %v966_v63 }
 0x2ac   : > { %1006 = vst.msk [vmem:[%s1549_s18 + $0x58] sm:$0xff] %vm994_vm3, %v991_v0 }
 0x2af   : > { %v969_v1 = vpop.xlane.xlu0 %968 }
 0x2b0   : > { %v992_v2 = vadd.f32 %v1136_v33, %v969_v1 }
 0x2b1   : > { %v972_v3 = vpop.xlane.xlu1 %971 }
 0x2b2   : > { %1007 = vst.msk [vmem:[%s1549_s18 + $0x60] sm:$0xff] %vm994_vm3, %v992_v2  ;;  %v993_v4 = vadd.f32 %v1136_v33, %v972_v3 }
 0x2b4   : > { %1008 = vst.msk [vmem:[%s1549_s18 + $0x68] sm:$0xff] %vm994_vm3, %v993_v4 }
 0x2b5 PF: > { %s20_s26 = sadd.s32 1, %s1292_s26  }
 0x2b6   : > { %p17_p3 = scmp.ge.s32.totalorder %s20_s26, 4  }
 0x2b8   :  { %19 = sbr.rel (!%p17_p3) target bundleno = 4 (0x4), region = 83 }
 0x2bf   :  { %1031 = vsyncpa [#allocation4], 1 }
 0x2c0   :  { %1033 = vsyncpa [#allocation4 + $0x1], 1 }

</bundles_post_ra>
